<compile_context>
chip_gen: v5e
topology: v5e:2x2
jax: 0.10.0
libtpu: 0.0.40
codegen_flags: <defaults>
</compile_context>

<pallas_src>
import jax
import jax.numpy as jnp
from jax.experimental import pallas as pl
from jax.experimental.pallas import tpu as pltpu


def _residual_kernel(x_ref, w_ref, b_ref, o_ref):
    # x_ref: (1, C, THW)  w_ref: (C, C)  b_ref: (C, 1)  o_ref: (1, C, THW)
    x = x_ref[0]                                                     # (C_in, THW)
    # fn(x): 1x1-conv channel mix; contraction over C (sublanes), THW on lanes.
    y = jnp.dot(w_ref[...], x, preferred_element_type=jnp.float32)  # (C_out, THW)
    # bias + residual add in f32, single cast at the store.
    o_ref[0] = (y + b_ref[...] + x.astype(jnp.float32)).astype(o_ref.dtype)


def residual_pointwise(x_nchw, weight, bias, *, tile_hw=1024):
    """Computes fn(x) + x where fn is a 1x1 conv with (weight, bias).

    x_nchw : (N, C, H, W)
    weight : (C_out, C_in) with C_out == C_in == C  (PyTorch conv1x1 weight squeezed)
    bias   : (C,)
    """
    N, C, H, W = x_nchw.shape
    HW = H * W

    # NCHW is already (N, C, H*W) contiguous: this reshape is layout-free.
    x3 = x_nchw.reshape(N, C, HW)
    b2d = bias.reshape(C, 1)   # broadcast across lanes inside the kernel

    # Spatial tile: full extent if it fits in one block, else a multiple of 128
    # lanes; ragged last block is masked by Pallas partial stores (no padding).
    if HW <= tile_hw:
        thw = HW
    else:
        thw = max((tile_hw // 128) * 128, 128)
    grid = (N, pl.cdiv(HW, thw))

    itemsize = jnp.dtype(x_nchw.dtype).itemsize
    # double-buffered x/out tiles + weight + bias (weight/bias index maps are
    # constant; TODO(synk): single-buffer them via pipeline_mode once stable).
    tile_bytes = (4 * thw * C + 2 * C * C + 2 * C) * itemsize
    vmem_limit = int(min(max(2 * tile_bytes, 32 * 1024 * 1024), 64 * 1024 * 1024))

    cost = pl.CostEstimate(
        flops=2 * N * HW * C * C,
        transcendentals=0,
        bytes_accessed=(2 * N * C * HW + C * C + C) * itemsize,
    )

    out = pl.pallas_call(
        _residual_kernel,
        out_shape=jax.ShapeDtypeStruct((N, C, HW), x_nchw.dtype),
        grid=grid,
        in_specs=[
            pl.BlockSpec((1, C, thw), lambda n, j: (n, 0, j)),   # x tile
            pl.BlockSpec((C, C), lambda n, j: (0, 0)),           # weight (replicated)
            pl.BlockSpec((C, 1), lambda n, j: (0, 0)),           # bias (replicated)
        ],
        out_specs=pl.BlockSpec((1, C, thw), lambda n, j: (n, 0, j)),
        compiler_params=pltpu.CompilerParams(
            dimension_semantics=("parallel", "parallel"),
            vmem_limit_bytes=vmem_limit,
        ),
        cost_estimate=cost,
    )(x3, weight, b2d)

    return out.reshape(N, C, H, W)


if __name__ == "__main__":
    key = jax.random.PRNGKey(0)
    kx, kw, kb = jax.random.split(key, 3)

    N, C, H, W = 2, 4, 16, 16
    x = jax.random.normal(kx, (N, C, H, W), dtype=jnp.float32)

    # deterministic "fn" parameters (1x1 conv weight/bias, synthetic init)
    weight = jax.random.normal(kw, (C, C), dtype=jnp.float32) * 0.1
    bias = jax.random.normal(kb, (C,), dtype=jnp.float32) * 0.1

    out = residual_pointwise(x, weight, bias)
    out = jax.block_until_ready(out)

    # reference: fn(x) + x in plain JAX (NCHW 1x1 conv == einsum over channel)
    ref = jnp.einsum("oc,nchw->nohw", weight, x) + bias[None, :, None, None] + x
    assert out.shape == (N, C, H, W)
    assert jnp.allclose(out, ref, atol=1e-5, rtol=1e-5), "mismatch vs reference"

    print("KERNEL_OK")
</pallas_src>

<mosaic_0001>
module attributes {stable_mosaic.version = 11 : i64} {
  func.func @_residual_kernel(%arg0: i32, %arg1: i32, %arg2: memref<1x4x256xf32, #tpu.memory_space<vmem>>, %arg3: memref<4x4xf32, #tpu.memory_space<vmem>>, %arg4: memref<4x1xf32, #tpu.memory_space<vmem>>, %arg5: memref<1x4x256xf32, #tpu.memory_space<vmem>>) attributes {dimension_semantics = [#tpu.dimension_semantics<parallel>, #tpu.dimension_semantics<parallel>], iteration_bounds = array<i64: 2, 1>, scalar_prefetch = 0 : i64, scratch_operands = 0 : i64, tpu.core_type = #tpu.core_type<tc>, window_params = [{transform_indices = @transform_0, window_bounds = array<i64: 1, 4, 256>}, {pipeline_mode = #tpu.pipeline_mode<synchronous>, transform_indices = @transform_1, window_bounds = array<i64: 4, 4>}, {pipeline_mode = #tpu.pipeline_mode<synchronous>, transform_indices = @transform_2, window_bounds = array<i64: 4, 1>}, {transform_indices = @transform_3, window_bounds = array<i64: 1, 4, 256>}]} {
    %c0 = arith.constant 0 : index
    %c0_0 = arith.constant 0 : index
    %c0_1 = arith.constant 0 : index
    %0 = vector.load %arg2[%c0, %c0_0, %c0_1] : memref<1x4x256xf32, #tpu.memory_space<vmem>>, vector<1x4x256xf32>
    %1 = vector.shape_cast %0 : vector<1x4x256xf32> to vector<4x256xf32>
    %c0_2 = arith.constant 0 : index
    %c0_3 = arith.constant 0 : index
    %2 = vector.load %arg3[%c0_2, %c0_3] : memref<4x4xf32, #tpu.memory_space<vmem>>, vector<4x4xf32>
    %cst = arith.constant dense<0.000000e+00> : vector<4x256xf32>
    %3 = tpu.matmul %2, %1, %cst {dimension_numbers = #tpu.dot_dimension_numbers<[1], [0], [0], [1], [0, 0, 1, 1], [], []>} : vector<4x4xf32>, vector<4x256xf32>, vector<4x256xf32> -> vector<4x256xf32>
    %c0_4 = arith.constant 0 : index
    %c0_5 = arith.constant 0 : index
    %4 = vector.load %arg4[%c0_4, %c0_5] : memref<4x1xf32, #tpu.memory_space<vmem>>, vector<4x1xf32>
    %5 = vector.broadcast %4 : vector<4x1xf32> to vector<4x256xf32>
    %6 = arith.addf %3, %5 : vector<4x256xf32>
    %7 = arith.addf %6, %1 : vector<4x256xf32>
    %c0_6 = arith.constant 0 : index
    %c0_7 = arith.constant 0 : index
    %c0_8 = arith.constant 0 : index
    %8 = vector.load %arg5[%c0_6, %c0_7, %c0_8] : memref<1x4x256xf32, #tpu.memory_space<vmem>>, vector<1x4x256xf32>
    %9 = vector.shape_cast %8 : vector<1x4x256xf32> to vector<4x256xf32>
    %10 = vector.shape_cast %7 : vector<4x256xf32> to vector<1x4x256xf32>
    tpu.vector_store %arg5[%c0_6, %c0_7, %c0_8], %10 {strides = array<i32>} : memref<1x4x256xf32, #tpu.memory_space<vmem>>, vector<1x4x256xf32>,
    return
  }
  func.func @transform_0(%arg0: i32, %arg1: i32) -> (i32, i32, i32) {
    %c0_i32 = arith.constant 0 : i32
    %c0_i32_0 = arith.constant 0 : i32
    return %arg0, %c0_i32, %arg1 : i32, i32, i32
  }
  func.func @transform_1(%arg0: i32, %arg1: i32) -> (i32, i32) {
    %c0_i32 = arith.constant 0 : i32
    %c0_i32_0 = arith.constant 0 : i32
    %c0_i32_1 = arith.constant 0 : i32
    return %c0_i32, %c0_i32_0 : i32, i32
  }
  func.func @transform_2(%arg0: i32, %arg1: i32) -> (i32, i32) {
    %c0_i32 = arith.constant 0 : i32
    %c0_i32_0 = arith.constant 0 : i32
    %c0_i32_1 = arith.constant 0 : i32
    return %c0_i32, %c0_i32_0 : i32, i32
  }
  func.func @transform_3(%arg0: i32, %arg1: i32) -> (i32, i32, i32) {
    %c0_i32 = arith.constant 0 : i32
    %c0_i32_0 = arith.constant 0 : i32
    return %arg0, %c0_i32, %arg1 : i32, i32, i32
  }
}

</mosaic_0001>

<bundles_post_ra>
// kernel: tpu_custom_call.1
= control target key start
LH: loop header
LB: loop body
LE: loop exit
PB: predicated region body
PF: predicated region fallthrough
CT: control target
= control target key end

     0   :  { %8 = vsyncpa [#allocation3], 0  ;;  %s739_s0 = inlined_call_operand.hbm [shape: f32[2,4,256], index: 0, kind: input, shape index: {}]   ;;  %s740_s1 = inlined_call_operand.vmem [shape: f32[4,4], index: 1, kind: input, shape index: {}]   ;;  %s741_s2 = inlined_call_operand.vmem [shape: f32[4,1], index: 2, kind: input, shape index: {}]   ;;  %s742_s3 = inlined_call_operand.hbm [shape: f32[2,4,256], index: 3, kind: output, shape index: {}]  }
   0x1   :  { %10 = vsyncpa [#allocation3 + $0x1], 0 }
   0x2   :  { %11 = vsyncpa [#allocation4], 0 }
   0x3   :  { %13 = vsyncpa [#allocation4 + $0x1], 0  ;;  %s606_s12 = smov 0   ;;  %s608_s13 = smov 0  }
   0x4   :  { %s610_s14 = smov 0   ;;  %s612_s15 = smov 0  }
   0x5   :  { %s614_s16 = smov 0   ;;  %s616_s17 = smov 0  }
   0x6 LB: > { %s386_s18 = sadd.s32 4294967295, %s583_s17   ;;  %s387_s19 = sadd.s32 4294967294, %s583_s17   ;;  %s583_s17 = sphi %s616_s17, %s19_s17   ;;  %s579_s16 = sphi %s614_s16, %s751_s16   ;;  %s575_s15 = sphi %s612_s15, %s750_s15   ;;  %s571_s14 = sphi %s610_s14, %s749_s14   ;;  %s567_s13 = sphi %s608_s13, %s748_s13   ;;  %s563_s12 = sphi %s606_s12, %s747_s12  }
   0x7   : > { %s31_s20 = sadd.s32 1, %s579_s16  ;;  %s40_s21 = sadd.s32 1, %s571_s14 }
   0x8   : > { %p33_p0 = scmp.ge.s32.totalorder %s31_s20, 2  ;;  %p47_p1 = scmp.ne.s32.totalorder %s571_s14, %s567_s13 }
   0x9   : > { %p48_p2 = scmp.eq.s32.totalorder %s583_s17, 0  ;;  %p53_p3 = scmp.ne.s32.totalorder %s567_s13, %s563_s12 }
   0xa   : > { %s753_s20 = smov (%p33_p0, %s31_s20), 0  ;;  %p54_p5 = scmp.eq.s32.totalorder %s386_s18, 0 }
   0xb   : > { %p647_p4 = por %p48_p2, %p47_p1  ;;  %s35_s23 = ssub.s32 %s579_s16, %s753_s20 }
   0xc   : > { %p121_p6 = scmp.eq.s32.totalorder %s386_s18, 1  ;;  %p38_p7 = scmp.eq.s32.totalorder %s35_s23, 0 }
   0xd   : > { %p653_p8 = por %p54_p5, %p53_p3  ;;  %p127_p10 = scmp.eq.s32.totalorder %s387_s19, 1 }
   0xe   : > { %p657_p9 = por %p121_p6, %p47_p1  ;;  %p389_p12 = scmp.ge.s32.totalorder %s583_s17, 2 }
   0xf   : > { %s662_s26 = scalar_select %p38_p7, %s571_s14, %s40_s21  }
  0x10   : > { %p664_p11 = por %p127_p10, %p53_p3  ;;  %p419_p13 = scmp.lt.s32.totalorder %s583_s17, 2 }
  0x11   : > { %s153_s28 = sand.u32 1, %s571_s14   ;;  %s405_s30 = sshll.u32 %s579_s16, 3 }
  0x12   : > { %s390_s29 = sshll.u32 %s153_s28, 3  ;;  %s164_s6 = scalar_lea.hbm %s739_s0, %s405_s30 }
  0x13   : > { %s157_s7 = scalar_lea.vmem [#allocation2], %s390_s29  ;;  %s166_s9 = sshll.u32 %s164_s6, 4  ;;  %s167_s9 = int_to_ptr.hbm [resolvable:$true] %s166_s9 }
  0x14   : > { %s168_s8 = sshll.u32 %s157_s7, 4  ;;  %p412_p0 = pnand %p419_p13, %p647_p4  ;;  %s169_s8 = int_to_ptr.vmem [resolvable:$true] %s168_s8 }
  0x15   : > { %p393_p1 = scmp.ge.s32.totalorder %s583_s17, 1  ;;  %p173_p2 = scmp.lt.s32.totalorder %s583_s17, 3 }
  0x16   : > { %s154_s10 = scalar_lea.sflag [#allocation3], %s153_s28 }
  0x17   : > { %414 = dma.hbm_to_vmem [thread:$0]  (!%p412_p0), %s167_s9, 128, %s169_s8, %s154_s10  }
  0x18   : > { %p174_p3 = pnand %p393_p1, %p173_p2 }
  0x19   : > { %s680_s11 = sand.u32 (!%p174_p3), 1, %s567_s13  }
  0x1a   : > { %177 = sbr.rel (%p174_p3) target bundleno = 178 (0xb2), region = 32  ;;  %s394_s18 = sshll.u32 (!%p174_p3), %s680_s11, 3 }
  0x1b   : > { %s180_s19 = scalar_lea.sflag (!%p174_p3), [#allocation3], %s680_s11  ;;  %s183_s21 = scalar_lea.vmem (!%p174_p3), [#allocation2], %s394_s18 }
  0x1f   : > { %554 = dma.done.wait (%p653_p8), %s180_s19, 128  }
  0x20   : > { %556 = vsyncadd (%p653_p8), %s180_s19, 4294967168  ;;  %v585_v0 = vmov 0   ;;  %v209_v1 = vld [vmem:[%s183_s21] sm:$0xff]  ;;  %v211_v2 = vld [vmem:[%s741_s2] sm:$0xf]  ;;  %vm225_vm0 = vcmask 1043456  }
  0x21   : > { %470 = vset.pattern.permute.xlu0 %v585_v0  ;;  %218 = vst [vmem:[#allocation1] ss:$2 sm:$0xff] %v209_v1  ;;  %v210_v3 = vld [vmem:[%s740_s1] sm:$0xf]  ;;  %vm221_vm1 = vcmask 31744   ;;  %s406_s24 = sshll.u32 %s575_s15, 3 }
  0x22   : > { %214 = vperm.xlu0 %470, %v211_v2   ;;  %s297_s5 = scalar_lea.hbm %s742_s3, %s406_s24  ;;  %s206_s6 = scalar_lea.vmem [#allocation5], %s394_s18 }
  0x23   : > { %s299_s7 = sshll.u32 %s206_s6, 4  ;;  %s301_s8 = sshll.u32 %s297_s5, 4  ;;  %s300_s7 = int_to_ptr.vmem [resolvable:$true] %s299_s7  ;;  %s302_s8 = int_to_ptr.hbm [resolvable:$true] %s301_s8 }
  0x24   : > { %s284_s15 = scalar_lea.sflag [#allocation4], %s680_s11  ;;  %s515_s9 = sshra.s32 %s302_s8, 4  ;;  %s516_s9 = int_to_ptr.hbm [resolvable:$true] %s515_s9 }
  0x25   : > { %s517_s10 = scalar_lea.hbm %s516_s9, 8  ;;  %s521_s18 = scalar_lea.hbm %s742_s3, 16 }
  0x26   : > { %p518_p4 = scmp.ne.s32.totalorder %s516_s9, %s517_s10  ;;  %p522_p7 = scmp.lt.s32.totalorder %s516_s9, %s742_s3 }
  0x27   : > { %p523_p8 = scmp.lt.s32.totalorder %s521_s18, %s517_s10 }
  0x28   : > { %v219_v4 = vld.sshfl [vmem:[#allocation1] sm:$0xff pattern:$0x75316420]  ;;  %v220_v5 = vld.sshfl [vmem:[#allocation1 + $0x8] sm:$0xff pattern:$0x75316420]  ;;  %p519_p5 = pnand %p518_p4, %p657_p9 }
  0x29   : > { %396 = vmatpush.msk.msra.mxu0 %vm225_vm0, %v219_v4  ;;  %398 = vmatpush.msk.msra.mxu1 %vm225_vm0, %v220_v5  ;;  %270 = vst [vmem:[#allocation1] ss:$2 sm:$0xff] %v209_v1  ;;  %p524_p10 = por %p523_p8, %p522_p7 }
  0x2a   : > { %397 = vmatmul.msk.f32.vlgmr.msra.gmra.mxu0 %vm221_vm1, %v210_v3  ;;  %399 = vmatmul.msk.f32.vlgmr.msra.gmra.mxu1 %vm221_vm1, %v210_v3  ;;  %p520_p6 = pneg %p519_p5 }
  0x2c   : > { %p525_p13 = pnand %p524_p10, %p520_p6 }
  0x30   : > { %v272_v9 = vld.sshfl [vmem:[#allocation1 + $0x8] sm:$0xff pattern:$0x75316420]  ;;  %v271_v12 = vld.sshfl [vmem:[#allocation1] sm:$0xff pattern:$0x75316420] }
  0x94   : > { %v215_v6 = vpop.permute.xlu0 %214 }
  0xa7   : > { %v247_v7 = vpop.f32.mrf.mxu0  ;;  %v267_v8 = vpop.f32.mrf.mxu1 }
  0xa8   : > { %v248_v10 = vadd.f32 %v247_v7, %v215_v6  ;;  %v268_v11 = vadd.f32 %v267_v8, %v215_v6 }
  0xaa   : > { %v276_v13 = vadd.f32 %v272_v9, %v268_v11  ;;  %v275_v14 = vadd.f32 %v271_v12, %v248_v10 }
  0xac   : > { %v279_v15 = vrot.slane %v276_v13, 4 }
  0xae   : > { %v280_v16 = vsel %vm225_vm0, %v275_v14, %v279_v15 }
  0xaf   : > { %282 = vst [vmem:[%s206_s6] sm:$0xff] %v280_v16 }
  0xb0   : > { %528 = shalt.err (!%p525_p13)
}
  0xb1   : > { %409 = dma.vmem_to_hbm [thread:$0]  (%p657_p9), %s300_s7, 128, %s302_s8, %s284_s15  }
  0xb2 PF: > { %s313_s11 = sand.u32 1, %s563_s12   ;;  %p416_p0 = pnand %p389_p12, %p664_p11 }
  0xb3   : > { %s314_s28 = scalar_lea.sflag [#allocation4], %s313_s11 }
  0xb4   : > { %p417_p1 = pneg %p416_p0 }
  0xb6   : > { %558 = dma.done.wait (%p417_p1), %s314_s28, 128  }
  0xb7   : > { %560 = vsyncadd (%p417_p1), %s314_s28, 4294967168  ;;  %s19_s17 = sadd.s32 1, %s583_s17   ;;  %s747_s12 = smov %s567_s13 }
  0xb8   : > { %p16_p2 = scmp.ge.s32.totalorder %s19_s17, 4   ;;  %s748_s13 = smov %s571_s14 }
  0xb9   : > { %s749_s14 = smov %s662_s26  ;;  %s750_s15 = smov %s579_s16 }
  0xba   : > { %s751_s16 = smov %s753_s20  ;;  %18 = sbr.rel (!%p16_p2) target bundleno = 6 (0x6), region = 77 }
  0xbf   :  { %320 = vsyncpa [#allocation3], 1 }
  0xc0   :  { %322 = vsyncpa [#allocation3 + $0x1], 1 }
  0xc1   :  { %323 = vsyncpa [#allocation4], 1 }
  0xc2   :  { %325 = vsyncpa [#allocation4 + $0x1], 1 }

</bundles_post_ra>
